<compile_context>
chip_gen: v7x
topology: tpu7x:2x2x1
jax: 0.10.0
libtpu: 0.0.40
codegen_flags: <defaults>
</compile_context>

<pallas_src>
import functools

import jax
import jax.numpy as jnp
from jax.experimental import pallas as pl
from jax.experimental.pallas import tpu as pltpu


# ----------------------------------------------------------------------------
# Pallas kernel: full MBConv hot path for one block of `batch_tile` samples,
# layout (C, batch_tile * hw_pad):
#   expand (1x1 conv + BN + SiLU) -> depthwise KxK conv + BN + SiLU
#   -> squeeze-excitation          -> project (1x1 conv + BN) [-> + residual]
# ----------------------------------------------------------------------------
def mbc_kernel(
    x_ref,       # (Cin, L)     bf16 input block (batch_tile samples, lane-folded)
    masks_ref,   # (K*K, L)     f32 precomputed depthwise edge masks
    valid_ref,   # (1, hw_pad)  f32 spatial-validity row (SE pooling w/ padding)
    we_ref,      # (Chid, Cin)  bf16 expand 1x1 weight (transposed)
    s1_ref,      # (Chid, 1)    folded BN1 scale
    b1_ref,      # (Chid, 1)    folded BN1 shift
    wdw_ref,     # (Chid, K*K)  depthwise conv weight
    s2_ref,      # (Chid, 1)
    b2_ref,      # (Chid, 1)
    wse1_ref,    # (Chid, Cred) SE reduce weight (transposed)
    bse1_ref,    # (1, Cred)
    wse2_ref,    # (Chid, Cred) SE expand weight
    bse2_ref,    # (Chid, 1)
    wp_ref,      # (Cout, Chid) bf16 project 1x1 weight (transposed)
    s3_ref,      # (Cout, 1)
    b3_ref,      # (Cout, 1)
    out_ref,     # (Cout, L)
    *,
    hw,
    hw_pad,
    img_w,
    batch_tile,
    kernel_size,
    padding,
    expand,
    use_residual,
):
    L = batch_tile * hw_pad
    x = x_ref[...]                                        # (Cin, L), bf16

    # --- expand: 1x1 conv as (Chid,Cin)@(Cin,L) bf16 MXU matmul + BN + SiLU ---
    if expand:
        h = jnp.dot(we_ref[...], x, preferred_element_type=jnp.float32)
        h = h * s1_ref[...] + b1_ref[...]
        h = h * jax.nn.sigmoid(h)                         # SiLU
    else:
        h = x.astype(jnp.float32)
    C = h.shape[0]

    # --- depthwise KxK conv (stride 1, zero pad): XLU lane rolls + hoisted ----
    # --- (precomputed) edge masks; no in-kernel iota / compare arithmetic  ----
    K, P, W = kernel_size, padding, img_w
    wdw = wdw_ref[...].astype(jnp.float32)                # (C, K*K)
    acc = jnp.zeros((C, L), jnp.float32)
    for di in range(K):
        for dj in range(K):
            s = (di - P) * W + (dj - P)                   # static flat shift
            shifted = h if s == 0 else pltpu.roll(h, shift=(-s) % L, axis=1)
            t = di * K + dj
            acc = acc + shifted * masks_ref[t:t + 1, :] * wdw[:, t:t + 1]
    h = acc * s2_ref[...] + b2_ref[...]                   # BN2
    h = h * jax.nn.sigmoid(h)                             # SiLU

    # --- squeeze-excitation, per sample (VPU multiplies + XLU reductions) -----
    valid = valid_ref[...]                                # (1, hw_pad)
    inv_hw = 1.0 / float(hw)
    parts = []
    for b in range(batch_tile):
        hb = h[:, b * hw_pad:(b + 1) * hw_pad]            # (C, hw_pad) lane-aligned
        if hw_pad == hw:
            pooled = jnp.mean(hb, axis=1, keepdims=True)  # (C, 1)
        else:
            pooled = jnp.sum(hb * valid, axis=1, keepdims=True) * inv_hw
        se = jnp.sum(wse1_ref[...] * pooled, axis=0, keepdims=True) + bse1_ref[...]
        se = se * jax.nn.sigmoid(se)                      # SiLU, (1, Cred)
        gate = jax.nn.sigmoid(
            jnp.sum(wse2_ref[...] * se, axis=1, keepdims=True) + bse2_ref[...])
        parts.append(hb * gate)                           # channel gate
    h = parts[0] if batch_tile == 1 else jnp.concatenate(parts, axis=1)

    # --- project: (Cout,Chid)@(Chid,L) matmul kept in f32 (accuracy) + BN ------
    o = jnp.dot(wp_ref[...].astype(jnp.float32), h,
                preferred_element_type=jnp.float32)
    o = o * s3_ref[...] + b3_ref[...]

    # --- residual (stochastic_depth is identity in eval mode) ------------------
    if use_residual:
        o = o + x.astype(jnp.float32)

    out_ref[...] = o.astype(out_ref.dtype)                # lane-dense store


# ----------------------------------------------------------------------------
# Host-side precompute: depthwise zero-padding edge masks for one sample.
# ----------------------------------------------------------------------------
def _dw_edge_masks(H, W, hw_pad, K, P):
    q = jnp.arange(hw_pad, dtype=jnp.int32)
    row, col = q // W, q % W
    in_img = q < H * W
    rows = []
    for di in range(K):
        for dj in range(K):
            dr, dc = di - P, dj - P
            m = (in_img & (row + dr >= 0) & (row + dr < H)
                 & (col + dc >= 0) & (col + dc < W))
            rows.append(m)
    return jnp.stack(rows).astype(jnp.float32)            # (K*K, hw_pad)


# ----------------------------------------------------------------------------
# Wrapper
# ----------------------------------------------------------------------------
def mbc_block(x_nchw, params, *, kernel_size, stride, padding, expand,
              use_residual, out_dtype=jnp.bfloat16, batch_tile=None):
    assert stride == 1, "stride=1 required in this implementation"
    N, Cin, H, W = x_nchw.shape
    Cout, Chid = params["wp"].shape
    if use_residual:
        assert Cin == Cout, "use_residual requires in_channels == out_channels"
    HW = H * W
    hw_pad = ((HW + 127) // 128) * 128                    # lane-align each sample
    if batch_tile is None:
        # Exactly two grid steps when N >= 2 (keeps both v7x TensorCores busy)
        # while maximizing per-step lane width.
        batch_tile = max(1, (N + 1) // 2)
    num_blocks = (N + batch_tile - 1) // batch_tile
    n_pad = num_blocks * batch_tile
    L_block = batch_tile * hw_pad

    # (N, Cin, H, W) -> (Cin, n_pad, hw_pad) -> (Cin, n_pad*hw_pad), bf16.
    x = x_nchw.reshape(N, Cin, HW).transpose(1, 0, 2).astype(jnp.bfloat16)
    x = jnp.pad(x, ((0, 0), (0, n_pad - N), (0, hw_pad - HW)))
    x = x.reshape(Cin, n_pad * hw_pad)

    masks = jnp.tile(_dw_edge_masks(H, W, hw_pad, kernel_size, padding),
                     (1, batch_tile))                     # (K*K, L_block)
    valid = (jnp.arange(hw_pad) < HW).astype(jnp.float32)[None, :]

    param_order = ["we", "s1", "b1", "wdw", "s2", "b2",
                   "wse1", "bse1", "wse2", "bse2", "wp", "s3", "b3"]
    param_arrays = [params[k] for k in param_order]

    def const_spec(arr):
        nd = arr.ndim
        return pl.BlockSpec(arr.shape, lambda i, _nd=nd: (0,) * _nd)

    kernel = functools.partial(
        mbc_kernel, hw=HW, hw_pad=hw_pad, img_w=W, batch_tile=batch_tile,
        kernel_size=kernel_size, padding=padding, expand=expand,
        use_residual=use_residual)

    # Analytic VMEM budget (double-buffered I/O blocks + masks + live f32
    # intermediates), clamped to stay inside v7x's 64 MiB physical VMEM.
    out_isize = jnp.zeros((), out_dtype).dtype.itemsize
    param_bytes = sum(int(a.size) * a.dtype.itemsize for a in param_arrays)
    vmem_need = (2 * 2 * (Cin + Cout) * L_block
                 + 2 * 4 * kernel_size * kernel_size * L_block
                 + 8 * Chid * L_block * 4
                 + 2 * param_bytes)
    vmem_limit = int(min(max(4 * vmem_need, 16 * 2 ** 20), 64 * 2 ** 20))

    flops = 2 * N * HW * ((Chid * Cin if expand else 0)
                          + Cout * Chid + kernel_size * kernel_size * Chid)
    cost = pl.CostEstimate(
        flops=int(flops),
        transcendentals=int(3 * N * HW * Chid),
        bytes_accessed=int(x.size * 2 + Cout * n_pad * hw_pad * out_isize
                           + param_bytes))

    out = pl.pallas_call(
        kernel,
        out_shape=jax.ShapeDtypeStruct((Cout, n_pad * hw_pad), out_dtype),
        grid=(num_blocks,),
        in_specs=[pl.BlockSpec((Cin, L_block), lambda i: (0, i)),
                  const_spec(masks), const_spec(valid)]
                 + [const_spec(a) for a in param_arrays],
        out_specs=pl.BlockSpec((Cout, L_block), lambda i: (0, i)),
        compiler_params=pltpu.CompilerParams(
            dimension_semantics=("parallel",),            # batch blocks independent
            vmem_limit_bytes=vmem_limit),
        cost_estimate=cost,
    )(x, masks, valid, *param_arrays)

    out = out.reshape(Cout, n_pad, hw_pad)[:, :N, :HW]
    return out.transpose(1, 0, 2).reshape(N, Cout, H, W)  # back to NCHW


# ----------------------------------------------------------------------------
# Deterministic parameter construction (shapes implied by MBCBlock.__init__),
# already laid out / transposed for the kernel.
# ----------------------------------------------------------------------------
def fold_bn(gamma, beta, mean, var, eps=1e-5):
    scale = gamma * jax.lax.rsqrt(var + eps)
    shift = beta - mean * scale
    return scale[:, None].astype(jnp.float32), shift[:, None].astype(jnp.float32)


def make_params(key, in_channels, out_channels, kernel_size, expand_ratio,
                reduction_ratio=0.25):
    hid = in_channels * expand_ratio
    red = int(hid * reduction_ratio)
    ks = jax.random.split(key, 16)

    def bn(k, c):
        k1, k2, k3, k4 = jax.random.split(k, 4)
        gamma = 1.0 + 0.1 * jax.random.normal(k1, (c,), jnp.float32)
        beta = 0.1 * jax.random.normal(k2, (c,), jnp.float32)
        mean = 0.05 * jax.random.normal(k3, (c,), jnp.float32)
        var = 1.0 + 0.1 * jnp.abs(jax.random.normal(k4, (c,), jnp.float32))
        return fold_bn(gamma, beta, mean, var)

    s1, b1 = bn(ks[0], hid)
    s2, b2 = bn(ks[1], hid)
    s3, b3 = bn(ks[2], out_channels)

    params = {
        # expand 1x1 conv: PyTorch (hid, Cin, 1, 1) -> (hid, Cin), bf16 for MXU
        "we": (0.1 * jax.random.normal(ks[3], (hid, in_channels),
                                       jnp.float32)).astype(jnp.bfloat16),
        "s1": s1, "b1": b1,
        # depthwise conv: PyTorch (hid, 1, K, K) -> (hid, K*K), f32 (VPU path)
        "wdw": 0.1 * jax.random.normal(
            ks[4], (hid, kernel_size * kernel_size), jnp.float32),
        "s2": s2, "b2": b2,
        # SE reduce 1x1 conv (with bias): PyTorch (red, hid, 1, 1) -> (hid, red)
        "wse1": 0.1 * jax.random.normal(ks[5], (hid, red), jnp.float32),
        "bse1": 0.05 * jax.random.normal(ks[6], (1, red), jnp.float32),
        # SE expand 1x1 conv (with bias): PyTorch (hid, red, 1, 1) -> (hid, red)
        "wse2": 0.1 * jax.random.normal(ks[7], (hid, red), jnp.float32),
        "bse2": 0.05 * jax.random.normal(ks[8], (hid, 1), jnp.float32),
        # project 1x1 conv: PyTorch (Cout, hid, 1, 1) -> (Cout, hid), bf16
        "wp": (0.1 * jax.random.normal(ks[9], (out_channels, hid),
                                       jnp.float32)).astype(jnp.bfloat16),
        "s3": s3, "b3": b3,
    }
    return params


# ----------------------------------------------------------------------------
# Pure-JAX reference (f32 math on the same bf16-stored weights/input)
# operating on (N, C, H*W) channels-first arrays.
# ----------------------------------------------------------------------------
def mbc_reference(x, p, *, H, W, kernel_size, padding, expand, use_residual):
    # x: (N, Cin, HW), f32 (already bf16-rounded to match the kernel input)
    if expand:
        h = jnp.einsum("oc,ncs->nos", p["we"].astype(jnp.float32), x)
        h = h * p["s1"] + p["b1"]
        h = h * jax.nn.sigmoid(h)
    else:
        h = x
    N, C, HW = h.shape
    K, P = kernel_size, padding
    h4 = h.reshape(N, C, H, W)
    hp = jnp.pad(h4, ((0, 0), (0, 0), (P, P), (P, P)))
    wdw = p["wdw"].reshape(C, K, K)
    acc = jnp.zeros_like(h4)
    for di in range(K):
        for dj in range(K):
            acc = acc + hp[:, :, di:di + H, dj:dj + W] * wdw[None, :, di, dj,
                                                             None, None]
    h = acc.reshape(N, C, HW)
    h = h * p["s2"] + p["b2"]
    h = h * jax.nn.sigmoid(h)
    pooled = jnp.mean(h, axis=2, keepdims=True)                        # (N,C,1)
    se = jnp.sum(p["wse1"][None] * pooled, axis=1, keepdims=True)      # (N,1,r)
    se = se + p["bse1"][None]
    se = se * jax.nn.sigmoid(se)
    gate = jnp.sum(p["wse2"][None] * se, axis=2, keepdims=True)        # (N,C,1)
    gate = jax.nn.sigmoid(gate + p["bse2"][None])
    h = h * gate
    o = jnp.einsum("oc,ncs->nos", p["wp"].astype(jnp.float32), h)
    o = o * p["s3"] + p["b3"]
    if use_residual:
        o = o + x
    return o


if __name__ == "__main__":
    # Small config consistent with MBCBlock:
    #   in_channels=4, out_channels=4, kernel_size=3, stride=1, padding=1,
    #   expand_ratio=4 -> hidden_dim=16, reduced_dim=4, use_residual=True
    in_channels, out_channels = 4, 4
    kernel_size, stride, padding = 3, 1, 1
    expand_ratio = 4
    hidden = in_channels * expand_ratio
    expand = in_channels != hidden                                 # True
    use_residual = (in_channels == out_channels) and stride == 1   # True

    key = jax.random.PRNGKey(0)
    kx, kp = jax.random.split(key)
    x = jax.random.normal(kx, (2, in_channels, 16, 16), jnp.float32)  # NCHW
    params = make_params(kp, in_channels, out_channels, kernel_size,
                         expand_ratio)

    out = mbc_block(x, params, kernel_size=kernel_size, stride=stride,
                    padding=padding, expand=expand, use_residual=use_residual)
    out = jax.block_until_ready(out)

    N, Cin, H, W = x.shape
    x_flat = x.reshape(N, Cin, H * W).astype(jnp.bfloat16).astype(jnp.float32)
    ref = mbc_reference(x_flat, params, H=H, W=W, kernel_size=kernel_size,
                        padding=padding, expand=expand,
                        use_residual=use_residual)
    ref = ref.reshape(N, out_channels, H, W)

    assert out.shape == (2, out_channels, 16, 16), out.shape
    out_f32 = out.astype(jnp.float32)
    # bf16 output -> compare with a relative criterion (~1 bf16 ulp budget).
    rel_err = float(jnp.max(jnp.abs(out_f32 - ref) /
                            jnp.maximum(jnp.abs(ref), 1.0)))
    assert rel_err < 1e-2, rel_err

    print("KERNEL_OK")
</pallas_src>

<mosaic_0001>
module attributes {stable_mosaic.version = 11 : i64} {
  func.func @mbc_kernel(%arg0: i32, %arg1: memref<4x256xbf16, #tpu.memory_space<vmem>>, %arg2: memref<9x256xf32, #tpu.memory_space<vmem>>, %arg3: memref<1x256xf32, #tpu.memory_space<vmem>>, %arg4: memref<16x4xbf16, #tpu.memory_space<vmem>>, %arg5: memref<16x1xf32, #tpu.memory_space<vmem>>, %arg6: memref<16x1xf32, #tpu.memory_space<vmem>>, %arg7: memref<16x9xf32, #tpu.memory_space<vmem>>, %arg8: memref<16x1xf32, #tpu.memory_space<vmem>>, %arg9: memref<16x1xf32, #tpu.memory_space<vmem>>, %arg10: memref<16x4xf32, #tpu.memory_space<vmem>>, %arg11: memref<1x4xf32, #tpu.memory_space<vmem>>, %arg12: memref<16x4xf32, #tpu.memory_space<vmem>>, %arg13: memref<16x1xf32, #tpu.memory_space<vmem>>, %arg14: memref<4x16xbf16, #tpu.memory_space<vmem>>, %arg15: memref<4x1xf32, #tpu.memory_space<vmem>>, %arg16: memref<4x1xf32, #tpu.memory_space<vmem>>, %arg17: memref<4x256xbf16, #tpu.memory_space<vmem>>) attributes {dimension_semantics = [#tpu.dimension_semantics<parallel>], iteration_bounds = array<i64: 2>, scalar_prefetch = 0 : i64, scratch_operands = 0 : i64, tpu.core_type = #tpu.core_type<tc>, window_params = [{transform_indices = @transform_0, window_bounds = array<i64: 4, 256>}, {pipeline_mode = #tpu.pipeline_mode<synchronous>, transform_indices = @transform_1, window_bounds = array<i64: 9, 256>}, {pipeline_mode = #tpu.pipeline_mode<synchronous>, transform_indices = @transform_2, window_bounds = array<i64: 1, 256>}, {pipeline_mode = #tpu.pipeline_mode<synchronous>, transform_indices = @transform_3, window_bounds = array<i64: 16, 4>}, {pipeline_mode = #tpu.pipeline_mode<synchronous>, transform_indices = @transform_4, window_bounds = array<i64: 16, 1>}, {pipeline_mode = #tpu.pipeline_mode<synchronous>, transform_indices = @transform_5, window_bounds = array<i64: 16, 1>}, {pipeline_mode = #tpu.pipeline_mode<synchronous>, transform_indices = @transform_6, window_bounds = array<i64: 16, 9>}, {pipeline_mode = #tpu.pipeline_mode<synchronous>, transform_indices = @transform_7, window_bounds = array<i64: 16, 1>}, {pipeline_mode = #tpu.pipeline_mode<synchronous>, transform_indices = @transform_8, window_bounds = array<i64: 16, 1>}, {pipeline_mode = #tpu.pipeline_mode<synchronous>, transform_indices = @transform_9, window_bounds = array<i64: 16, 4>}, {pipeline_mode = #tpu.pipeline_mode<synchronous>, transform_indices = @transform_10, window_bounds = array<i64: 1, 4>}, {pipeline_mode = #tpu.pipeline_mode<synchronous>, transform_indices = @transform_11, window_bounds = array<i64: 16, 4>}, {pipeline_mode = #tpu.pipeline_mode<synchronous>, transform_indices = @transform_12, window_bounds = array<i64: 16, 1>}, {pipeline_mode = #tpu.pipeline_mode<synchronous>, transform_indices = @transform_13, window_bounds = array<i64: 4, 16>}, {pipeline_mode = #tpu.pipeline_mode<synchronous>, transform_indices = @transform_14, window_bounds = array<i64: 4, 1>}, {pipeline_mode = #tpu.pipeline_mode<synchronous>, transform_indices = @transform_15, window_bounds = array<i64: 4, 1>}, {transform_indices = @transform_16, window_bounds = array<i64: 4, 256>}]} {
    %c0 = arith.constant 0 : index
    %c0_0 = arith.constant 0 : index
    %0 = vector.load %arg1[%c0, %c0_0] : memref<4x256xbf16, #tpu.memory_space<vmem>>, vector<4x256xbf16>
    %c0_1 = arith.constant 0 : index
    %c0_2 = arith.constant 0 : index
    %1 = vector.load %arg4[%c0_1, %c0_2] : memref<16x4xbf16, #tpu.memory_space<vmem>>, vector<16x4xbf16>
    %cst = arith.constant dense<0.000000e+00> : vector<16x256xf32>
    %2 = tpu.matmul %1, %0, %cst {dimension_numbers = #tpu.dot_dimension_numbers<[1], [0], [0], [1], [0, 0, 1, 1], [], []>} : vector<16x4xbf16>, vector<4x256xbf16>, vector<16x256xf32> -> vector<16x256xf32>
    %c0_3 = arith.constant 0 : index
    %c0_4 = arith.constant 0 : index
    %3 = vector.load %arg5[%c0_3, %c0_4] : memref<16x1xf32, #tpu.memory_space<vmem>>, vector<16x1xf32>
    %4 = vector.broadcast %3 : vector<16x1xf32> to vector<16x256xf32>
    %5 = arith.mulf %2, %4 : vector<16x256xf32>
    %c0_5 = arith.constant 0 : index
    %c0_6 = arith.constant 0 : index
    %6 = vector.load %arg6[%c0_5, %c0_6] : memref<16x1xf32, #tpu.memory_space<vmem>>, vector<16x1xf32>
    %7 = vector.broadcast %6 : vector<16x1xf32> to vector<16x256xf32>
    %8 = arith.addf %5, %7 : vector<16x256xf32>
    %9 = arith.negf %8 : vector<16x256xf32>
    %10 = math.exp %9 : vector<16x256xf32>
    %cst_7 = arith.constant 1.000000e+00 : f32
    %11 = vector.broadcast %cst_7 : f32 to vector<16x256xf32>
    %12 = arith.addf %11, %10 : vector<16x256xf32>
    %13 = arith.divf %11, %12 : vector<16x256xf32>
    %14 = arith.mulf %8, %13 : vector<16x256xf32>
    %c0_8 = arith.constant 0 : index
    %c0_9 = arith.constant 0 : index
    %15 = vector.load %arg7[%c0_8, %c0_9] : memref<16x9xf32, #tpu.memory_space<vmem>>, vector<16x9xf32>
    %cst_10 = arith.constant 0.000000e+00 : f32
    %16 = vector.broadcast %cst_10 : f32 to vector<16x256xf32>
    %c17_i32 = arith.constant 17 : i32
    %17 = tpu.dynamic_rotate %14 by %c17_i32 dim 1 : vector<16x256xf32>, i32 -> vector<16x256xf32>
    %c0_11 = arith.constant 0 : index
    %c0_12 = arith.constant 0 : index
    %18 = vector.load %arg2[%c0_11, %c0_12] : memref<9x256xf32, #tpu.memory_space<vmem>>, vector<1x256xf32>
    %19 = vector.broadcast %18 : vector<1x256xf32> to vector<16x256xf32>
    %20 = arith.mulf %17, %19 : vector<16x256xf32>
    %21 = vector.extract_strided_slice %15 {offsets = [0, 0], sizes = [16, 1], strides = [1, 1]} : vector<16x9xf32> to vector<16x1xf32>
    %22 = vector.broadcast %21 : vector<16x1xf32> to vector<16x256xf32>
    %23 = arith.mulf %20, %22 : vector<16x256xf32>
    %24 = arith.addf %16, %23 : vector<16x256xf32>
    %c16_i32 = arith.constant 16 : i32
    %25 = tpu.dynamic_rotate %14 by %c16_i32 dim 1 : vector<16x256xf32>, i32 -> vector<16x256xf32>
    %c1 = arith.constant 1 : index
    %c0_13 = arith.constant 0 : index
    %26 = vector.load %arg2[%c1, %c0_13] : memref<9x256xf32, #tpu.memory_space<vmem>>, vector<1x256xf32>
    %27 = vector.broadcast %26 : vector<1x256xf32> to vector<16x256xf32>
    %28 = arith.mulf %25, %27 : vector<16x256xf32>
    %29 = vector.extract_strided_slice %15 {offsets = [0, 1], sizes = [16, 1], strides = [1, 1]} : vector<16x9xf32> to vector<16x1xf32>
    %30 = vector.broadcast %29 : vector<16x1xf32> to vector<16x256xf32>
    %31 = arith.mulf %28, %30 : vector<16x256xf32>
    %32 = arith.addf %24, %31 : vector<16x256xf32>
    %c15_i32 = arith.constant 15 : i32
    %33 = tpu.dynamic_rotate %14 by %c15_i32 dim 1 : vector<16x256xf32>, i32 -> vector<16x256xf32>
    %c2 = arith.constant 2 : index
    %c0_14 = arith.constant 0 : index
    %34 = vector.load %arg2[%c2, %c0_14] : memref<9x256xf32, #tpu.memory_space<vmem>>, vector<1x256xf32>
    %35 = vector.broadcast %34 : vector<1x256xf32> to vector<16x256xf32>
    %36 = arith.mulf %33, %35 : vector<16x256xf32>
    %37 = vector.extract_strided_slice %15 {offsets = [0, 2], sizes = [16, 1], strides = [1, 1]} : vector<16x9xf32> to vector<16x1xf32>
    %38 = vector.broadcast %37 : vector<16x1xf32> to vector<16x256xf32>
    %39 = arith.mulf %36, %38 : vector<16x256xf32>
    %40 = arith.addf %32, %39 : vector<16x256xf32>
    %c1_i32 = arith.constant 1 : i32
    %41 = tpu.dynamic_rotate %14 by %c1_i32 dim 1 : vector<16x256xf32>, i32 -> vector<16x256xf32>
    %c3 = arith.constant 3 : index
    %c0_15 = arith.constant 0 : index
    %42 = vector.load %arg2[%c3, %c0_15] : memref<9x256xf32, #tpu.memory_space<vmem>>, vector<1x256xf32>
    %43 = vector.broadcast %42 : vector<1x256xf32> to vector<16x256xf32>
    %44 = arith.mulf %41, %43 : vector<16x256xf32>
    %45 = vector.extract_strided_slice %15 {offsets = [0, 3], sizes = [16, 1], strides = [1, 1]} : vector<16x9xf32> to vector<16x1xf32>
    %46 = vector.broadcast %45 : vector<16x1xf32> to vector<16x256xf32>
    %47 = arith.mulf %44, %46 : vector<16x256xf32>
    %48 = arith.addf %40, %47 : vector<16x256xf32>
    %c4 = arith.constant 4 : index
    %c0_16 = arith.constant 0 : index
    %49 = vector.load %arg2[%c4, %c0_16] : memref<9x256xf32, #tpu.memory_space<vmem>>, vector<1x256xf32>
    %50 = vector.broadcast %49 : vector<1x256xf32> to vector<16x256xf32>
    %51 = arith.mulf %14, %50 : vector<16x256xf32>
    %52 = vector.extract_strided_slice %15 {offsets = [0, 4], sizes = [16, 1], strides = [1, 1]} : vector<16x9xf32> to vector<16x1xf32>
    %53 = vector.broadcast %52 : vector<16x1xf32> to vector<16x256xf32>
    %54 = arith.mulf %51, %53 : vector<16x256xf32>
    %55 = arith.addf %48, %54 : vector<16x256xf32>
    %c255_i32 = arith.constant 255 : i32
    %56 = tpu.dynamic_rotate %14 by %c255_i32 dim 1 : vector<16x256xf32>, i32 -> vector<16x256xf32>
    %c5 = arith.constant 5 : index
    %c0_17 = arith.constant 0 : index
    %57 = vector.load %arg2[%c5, %c0_17] : memref<9x256xf32, #tpu.memory_space<vmem>>, vector<1x256xf32>
    %58 = vector.broadcast %57 : vector<1x256xf32> to vector<16x256xf32>
    %59 = arith.mulf %56, %58 : vector<16x256xf32>
    %60 = vector.extract_strided_slice %15 {offsets = [0, 5], sizes = [16, 1], strides = [1, 1]} : vector<16x9xf32> to vector<16x1xf32>
    %61 = vector.broadcast %60 : vector<16x1xf32> to vector<16x256xf32>
    %62 = arith.mulf %59, %61 : vector<16x256xf32>
    %63 = arith.addf %55, %62 : vector<16x256xf32>
    %c241_i32 = arith.constant 241 : i32
    %64 = tpu.dynamic_rotate %14 by %c241_i32 dim 1 : vector<16x256xf32>, i32 -> vector<16x256xf32>
    %c6 = arith.constant 6 : index
    %c0_18 = arith.constant 0 : index
    %65 = vector.load %arg2[%c6, %c0_18] : memref<9x256xf32, #tpu.memory_space<vmem>>, vector<1x256xf32>
    %66 = vector.broadcast %65 : vector<1x256xf32> to vector<16x256xf32>
    %67 = arith.mulf %64, %66 : vector<16x256xf32>
    %68 = vector.extract_strided_slice %15 {offsets = [0, 6], sizes = [16, 1], strides = [1, 1]} : vector<16x9xf32> to vector<16x1xf32>
    %69 = vector.broadcast %68 : vector<16x1xf32> to vector<16x256xf32>
    %70 = arith.mulf %67, %69 : vector<16x256xf32>
    %71 = arith.addf %63, %70 : vector<16x256xf32>
    %c240_i32 = arith.constant 240 : i32
    %72 = tpu.dynamic_rotate %14 by %c240_i32 dim 1 : vector<16x256xf32>, i32 -> vector<16x256xf32>
    %c7 = arith.constant 7 : index
    %c0_19 = arith.constant 0 : index
    %73 = vector.load %arg2[%c7, %c0_19] : memref<9x256xf32, #tpu.memory_space<vmem>>, vector<1x256xf32>
    %74 = vector.broadcast %73 : vector<1x256xf32> to vector<16x256xf32>
    %75 = arith.mulf %72, %74 : vector<16x256xf32>
    %76 = vector.extract_strided_slice %15 {offsets = [0, 7], sizes = [16, 1], strides = [1, 1]} : vector<16x9xf32> to vector<16x1xf32>
    %77 = vector.broadcast %76 : vector<16x1xf32> to vector<16x256xf32>
    %78 = arith.mulf %75, %77 : vector<16x256xf32>
    %79 = arith.addf %71, %78 : vector<16x256xf32>
    %c239_i32 = arith.constant 239 : i32
    %80 = tpu.dynamic_rotate %14 by %c239_i32 dim 1 : vector<16x256xf32>, i32 -> vector<16x256xf32>
    %c8 = arith.constant 8 : index
    %c0_20 = arith.constant 0 : index
    %81 = vector.load %arg2[%c8, %c0_20] : memref<9x256xf32, #tpu.memory_space<vmem>>, vector<1x256xf32>
    %82 = vector.broadcast %81 : vector<1x256xf32> to vector<16x256xf32>
    %83 = arith.mulf %80, %82 : vector<16x256xf32>
    %84 = vector.extract_strided_slice %15 {offsets = [0, 8], sizes = [16, 1], strides = [1, 1]} : vector<16x9xf32> to vector<16x1xf32>
    %85 = vector.broadcast %84 : vector<16x1xf32> to vector<16x256xf32>
    %86 = arith.mulf %83, %85 : vector<16x256xf32>
    %87 = arith.addf %79, %86 : vector<16x256xf32>
    %c0_21 = arith.constant 0 : index
    %c0_22 = arith.constant 0 : index
    %88 = vector.load %arg8[%c0_21, %c0_22] : memref<16x1xf32, #tpu.memory_space<vmem>>, vector<16x1xf32>
    %89 = vector.broadcast %88 : vector<16x1xf32> to vector<16x256xf32>
    %90 = arith.mulf %87, %89 : vector<16x256xf32>
    %c0_23 = arith.constant 0 : index
    %c0_24 = arith.constant 0 : index
    %91 = vector.load %arg9[%c0_23, %c0_24] : memref<16x1xf32, #tpu.memory_space<vmem>>, vector<16x1xf32>
    %92 = vector.broadcast %91 : vector<16x1xf32> to vector<16x256xf32>
    %93 = arith.addf %90, %92 : vector<16x256xf32>
    %94 = arith.negf %93 : vector<16x256xf32>
    %95 = math.exp %94 : vector<16x256xf32>
    %cst_25 = arith.constant 1.000000e+00 : f32
    %96 = vector.broadcast %cst_25 : f32 to vector<16x256xf32>
    %97 = arith.addf %96, %95 : vector<16x256xf32>
    %98 = arith.divf %96, %97 : vector<16x256xf32>
    %99 = arith.mulf %93, %98 : vector<16x256xf32>
    %cst_26 = arith.constant dense<0.000000e+00> : vector<16xf32>
    %100 = vector.multi_reduction <add>, %99, %cst_26 [1] : vector<16x256xf32> to vector<16xf32>
    %101 = vector.shape_cast %100 : vector<16xf32> to vector<16x1xf32>
    %cst_27 = arith.constant 2.560000e+02 : f32
    %102 = vector.broadcast %cst_27 : f32 to vector<16x1xf32>
    %103 = arith.divf %101, %102 : vector<16x1xf32>
    %c0_28 = arith.constant 0 : index
    %c0_29 = arith.constant 0 : index
    %104 = vector.load %arg10[%c0_28, %c0_29] : memref<16x4xf32, #tpu.memory_space<vmem>>, vector<16x4xf32>
    %105 = vector.broadcast %103 : vector<16x1xf32> to vector<16x4xf32>
    %106 = arith.mulf %104, %105 : vector<16x4xf32>
    %cst_30 = arith.constant dense<0.000000e+00> : vector<4xf32>
    %107 = vector.multi_reduction <add>, %106, %cst_30 [0] : vector<16x4xf32> to vector<4xf32>
    %108 = vector.shape_cast %107 : vector<4xf32> to vector<1x4xf32>
    %c0_31 = arith.constant 0 : index
    %c0_32 = arith.constant 0 : index
    %109 = vector.load %arg11[%c0_31, %c0_32] : memref<1x4xf32, #tpu.memory_space<vmem>>, vector<1x4xf32>
    %110 = arith.addf %108, %109 : vector<1x4xf32>
    %111 = arith.negf %110 : vector<1x4xf32>
    %112 = math.exp %111 : vector<1x4xf32>
    %cst_33 = arith.constant 1.000000e+00 : f32
    %113 = vector.broadcast %cst_33 : f32 to vector<1x4xf32>
    %114 = arith.addf %113, %112 : vector<1x4xf32>
    %115 = arith.divf %113, %114 : vector<1x4xf32>
    %116 = arith.mulf %110, %115 : vector<1x4xf32>
    %c0_34 = arith.constant 0 : index
    %c0_35 = arith.constant 0 : index
    %117 = vector.load %arg12[%c0_34, %c0_35] : memref<16x4xf32, #tpu.memory_space<vmem>>, vector<16x4xf32>
    %118 = vector.broadcast %116 : vector<1x4xf32> to vector<16x4xf32>
    %119 = arith.mulf %117, %118 : vector<16x4xf32>
    %cst_36 = arith.constant dense<0.000000e+00> : vector<16xf32>
    %120 = vector.multi_reduction <add>, %119, %cst_36 [1] : vector<16x4xf32> to vector<16xf32>
    %121 = vector.shape_cast %120 : vector<16xf32> to vector<16x1xf32>
    %c0_37 = arith.constant 0 : index
    %c0_38 = arith.constant 0 : index
    %122 = vector.load %arg13[%c0_37, %c0_38] : memref<16x1xf32, #tpu.memory_space<vmem>>, vector<16x1xf32>
    %123 = arith.addf %121, %122 : vector<16x1xf32>
    %124 = arith.negf %123 : vector<16x1xf32>
    %125 = math.exp %124 : vector<16x1xf32>
    %cst_39 = arith.constant 1.000000e+00 : f32
    %126 = vector.broadcast %cst_39 : f32 to vector<16x1xf32>
    %127 = arith.addf %126, %125 : vector<16x1xf32>
    %128 = arith.divf %126, %127 : vector<16x1xf32>
    %129 = vector.broadcast %128 : vector<16x1xf32> to vector<16x256xf32>
    %130 = arith.mulf %99, %129 : vector<16x256xf32>
    %c0_40 = arith.constant 0 : index
    %c0_41 = arith.constant 0 : index
    %131 = vector.load %arg14[%c0_40, %c0_41] : memref<4x16xbf16, #tpu.memory_space<vmem>>, vector<4x16xbf16>
    %132 = arith.extf %131 : vector<4x16xbf16> to vector<4x16xf32>
    %cst_42 = arith.constant dense<0.000000e+00> : vector<4x256xf32>
    %133 = tpu.matmul %132, %130, %cst_42 {dimension_numbers = #tpu.dot_dimension_numbers<[1], [0], [0], [1], [0, 0, 1, 1], [], []>} : vector<4x16xf32>, vector<16x256xf32>, vector<4x256xf32> -> vector<4x256xf32>
    %c0_43 = arith.constant 0 : index
    %c0_44 = arith.constant 0 : index
    %134 = vector.load %arg15[%c0_43, %c0_44] : memref<4x1xf32, #tpu.memory_space<vmem>>, vector<4x1xf32>
    %135 = vector.broadcast %134 : vector<4x1xf32> to vector<4x256xf32>
    %136 = arith.mulf %133, %135 : vector<4x256xf32>
    %c0_45 = arith.constant 0 : index
    %c0_46 = arith.constant 0 : index
    %137 = vector.load %arg16[%c0_45, %c0_46] : memref<4x1xf32, #tpu.memory_space<vmem>>, vector<4x1xf32>
    %138 = vector.broadcast %137 : vector<4x1xf32> to vector<4x256xf32>
    %139 = arith.addf %136, %138 : vector<4x256xf32>
    %140 = arith.extf %0 : vector<4x256xbf16> to vector<4x256xf32>
    %141 = arith.addf %139, %140 : vector<4x256xf32>
    %142 = arith.truncf %141 : vector<4x256xf32> to vector<4x256xbf16>
    %c0_47 = arith.constant 0 : index
    %c0_48 = arith.constant 0 : index
    %143 = vector.load %arg17[%c0_47, %c0_48] : memref<4x256xbf16, #tpu.memory_space<vmem>>, vector<4x256xbf16>
    tpu.vector_store %arg17[%c0_47, %c0_48], %142 {strides = array<i32>} : memref<4x256xbf16, #tpu.memory_space<vmem>>, vector<4x256xbf16>,
    return
  }
  func.func @transform_0(%arg0: i32) -> (i32, i32) {
    %c0_i32 = arith.constant 0 : i32
    %c0_i32_0 = arith.constant 0 : i32
    return %c0_i32, %arg0 : i32, i32
  }
  func.func @transform_1(%arg0: i32) -> (i32, i32) {
    %c0_i32 = arith.constant 0 : i32
    %c0_i32_0 = arith.constant 0 : i32
    %c0_i32_1 = arith.constant 0 : i32
    return %c0_i32, %c0_i32_0 : i32, i32
  }
  func.func @transform_2(%arg0: i32) -> (i32, i32) {
    %c0_i32 = arith.constant 0 : i32
    %c0_i32_0 = arith.constant 0 : i32
    %c0_i32_1 = arith.constant 0 : i32
    return %c0_i32, %c0_i32_0 : i32, i32
  }
  func.func @transform_3(%arg0: i32) -> (i32, i32) {
    %c0_i32 = arith.constant 0 : i32
    %c0_i32_0 = arith.constant 0 : i32
    %c0_i32_1 = arith.constant 0 : i32
    return %c0_i32, %c0_i32_0 : i32, i32
  }
  func.func @transform_4(%arg0: i32) -> (i32, i32) {
    %c0_i32 = arith.constant 0 : i32
    %c0_i32_0 = arith.constant 0 : i32
    %c0_i32_1 = arith.constant 0 : i32
    return %c0_i32, %c0_i32_0 : i32, i32
  }
  func.func @transform_5(%arg0: i32) -> (i32, i32) {
    %c0_i32 = arith.constant 0 : i32
    %c0_i32_0 = arith.constant 0 : i32
    %c0_i32_1 = arith.constant 0 : i32
    return %c0_i32, %c0_i32_0 : i32, i32
  }
  func.func @transform_6(%arg0: i32) -> (i32, i32) {
    %c0_i32 = arith.constant 0 : i32
    %c0_i32_0 = arith.constant 0 : i32
    %c0_i32_1 = arith.constant 0 : i32
    return %c0_i32, %c0_i32_0 : i32, i32
  }
  func.func @transform_7(%arg0: i32) -> (i32, i32) {
    %c0_i32 = arith.constant 0 : i32
    %c0_i32_0 = arith.constant 0 : i32
    %c0_i32_1 = arith.constant 0 : i32
    return %c0_i32, %c0_i32_0 : i32, i32
  }
  func.func @transform_8(%arg0: i32) -> (i32, i32) {
    %c0_i32 = arith.constant 0 : i32
    %c0_i32_0 = arith.constant 0 : i32
    %c0_i32_1 = arith.constant 0 : i32
    return %c0_i32, %c0_i32_0 : i32, i32
  }
  func.func @transform_9(%arg0: i32) -> (i32, i32) {
    %c0_i32 = arith.constant 0 : i32
    %c0_i32_0 = arith.constant 0 : i32
    %c0_i32_1 = arith.constant 0 : i32
    return %c0_i32, %c0_i32_0 : i32, i32
  }
  func.func @transform_10(%arg0: i32) -> (i32, i32) {
    %c0_i32 = arith.constant 0 : i32
    %c0_i32_0 = arith.constant 0 : i32
    %c0_i32_1 = arith.constant 0 : i32
    return %c0_i32, %c0_i32_0 : i32, i32
  }
  func.func @transform_11(%arg0: i32) -> (i32, i32) {
    %c0_i32 = arith.constant 0 : i32
    %c0_i32_0 = arith.constant 0 : i32
    %c0_i32_1 = arith.constant 0 : i32
    return %c0_i32, %c0_i32_0 : i32, i32
  }
  func.func @transform_12(%arg0: i32) -> (i32, i32) {
    %c0_i32 = arith.constant 0 : i32
    %c0_i32_0 = arith.constant 0 : i32
    %c0_i32_1 = arith.constant 0 : i32
    return %c0_i32, %c0_i32_0 : i32, i32
  }
  func.func @transform_13(%arg0: i32) -> (i32, i32) {
    %c0_i32 = arith.constant 0 : i32
    %c0_i32_0 = arith.constant 0 : i32
    %c0_i32_1 = arith.constant 0 : i32
    return %c0_i32, %c0_i32_0 : i32, i32
  }
  func.func @transform_14(%arg0: i32) -> (i32, i32) {
    %c0_i32 = arith.constant 0 : i32
    %c0_i32_0 = arith.constant 0 : i32
    %c0_i32_1 = arith.constant 0 : i32
    return %c0_i32, %c0_i32_0 : i32, i32
  }
  func.func @transform_15(%arg0: i32) -> (i32, i32) {
    %c0_i32 = arith.constant 0 : i32
    %c0_i32_0 = arith.constant 0 : i32
    %c0_i32_1 = arith.constant 0 : i32
    return %c0_i32, %c0_i32_0 : i32, i32
  }
  func.func @transform_16(%arg0: i32) -> (i32, i32) {
    %c0_i32 = arith.constant 0 : i32
    %c0_i32_0 = arith.constant 0 : i32
    return %c0_i32, %arg0 : i32, i32
  }
}

</mosaic_0001>

<bundles_post_ra>
// kernel: tpu_custom_call.1
= control target key start
LH: loop header
LB: loop body
LE: loop exit
PB: predicated region body
PF: predicated region fallthrough
CT: control target
= control target key end

     0   :  { %s2202_s0 = inlined_call_operand.vmem [shape: bf16[4,512], index: 0, kind: input, shape index: {}]   ;;  %s2203_s1 = inlined_call_operand.vmem [shape: f32[9,256], index: 1, kind: input, shape index: {}]   ;;  %s2204_s2 = inlined_call_operand.vmem [shape: f32[1,256], index: 2, kind: input, shape index: {}]   ;;  %s2205_s3 = inlined_call_operand.vmem [shape: bf16[16,4], index: 3, kind: input, shape index: {}]   ;;  %s2206_s4 = inlined_call_operand.vmem [shape: f32[16,1], index: 4, kind: input, shape index: {}]   ;;  %s2207_s5 = inlined_call_operand.vmem [shape: f32[16,1], index: 5, kind: input, shape index: {}]   ;;  %s2208_s6 = inlined_call_operand.vmem [shape: f32[16,9], index: 6, kind: input, shape index: {}]   ;;  %s2209_s7 = inlined_call_operand.vmem [shape: f32[16,1], index: 7, kind: input, shape index: {}]   ;;  %s2210_s8 = inlined_call_operand.vmem [shape: f32[16,1], index: 8, kind: input, shape index: {}]   ;;  %s2211_s9 = inlined_call_operand.vmem [shape: f32[16,4], index: 9, kind: input, shape index: {}]   ;;  %s2212_s10 = inlined_call_operand.vmem [shape: f32[1,4], index: 10, kind: input, shape index: {}]   ;;  %s2213_s11 = inlined_call_operand.vmem [shape: f32[16,4], index: 11, kind: input, shape index: {}]   ;;  %s2214_s12 = inlined_call_operand.vmem [shape: f32[16,1], index: 12, kind: input, shape index: {}]   ;;  %s2215_s13 = inlined_call_operand.vmem [shape: bf16[4,16], index: 13, kind: input, shape index: {}]   ;;  %s2216_s14 = inlined_call_operand.vmem [shape: f32[4,1], index: 14, kind: input, shape index: {}]   ;;  %s2217_s15 = inlined_call_operand.vmem [shape: f32[4,1], index: 15, kind: input, shape index: {}]   ;;  %s2218_s16 = inlined_call_operand.hbm [shape: bf16[4,512], index: 16, kind: output, shape index: {}]  }
   0x1   :  { %2223 = sst [smem:[#allocation9_spill]] %s2202_s0 }
   0x2   :  { %2224 = sst [smem:[#allocation10_spill]] %s2205_s3 }
   0x3   :  { %21 = vsyncpa [#allocation3], 0 }
   0x4   :  { %23 = vsyncpa [#allocation3 + $0x1], 0  ;;  %s1717_s20 = smov 0   ;;  %s1719_s2 = smov 0  }
   0x5   :  { %s1721_s21 = smov 0   ;;  %s1723_s22 = smov 0  }
   0x6 LB: > { %2225 = sst [smem:[#allocation5_spill]] %s1606_s21  ;;  %s1738_s23 = sadd.s32 4294967295, %s1610_s22   ;;  %s1610_s22 = sphi %s1723_s22, %s2234_s22   ;;  %s1606_s21 = sphi %s1721_s21, %s2236_s21   ;;  %s1602_s2 = sphi %s1719_s2, %s2238_s2   ;;  %s1598_s20 = sphi %s1717_s20, %s2237_s20  }
   0x7   : > { %s1383_s24 = sadd.s32 4294967294, %s1610_s22   ;;  %s1742_s25 = sadd.s32 1, %s1610_s22  }
   0x8   : > { %2226 = sst [smem:[#allocation6_spill]] %s1742_s25  ;;  %s377_s26 = sadd.s32 1, %s1606_s21 }
   0x9   : > { %s374_s27 = ssub.s32 %s1610_s22, %s1742_s25  ;;  %p387_p0 = scmp.ne.s32.totalorder %s1606_s21, %s1602_s2 }
   0xa   : > { %p375_p1 = scmp.eq.s32.totalorder %s374_s27, 0  ;;  %p388_p2 = scmp.eq.s32.totalorder %s1738_s23, 1 }
   0xb   : > { %p393_p3 = scmp.ne.s32.totalorder %s1602_s2, %s1598_s20  ;;  %p394_p4 = scmp.eq.s32.totalorder %s1383_s24, 1 }
   0xc   : > { %s1753_s28 = scalar_select %p375_p1, %s1606_s21, %s377_s26  }
   0xd   : > { %p1755_p5 = por %p388_p2, %p387_p0  ;;  %p1759_p6 = por %p394_p4, %p393_p3 }
   0xe   : > { %2227 = sst [smem:[#allocation7_spill]] %s1753_s28  ;;  %p1386_p7 = scmp.ge.s32.totalorder %s1610_s22, 1 }
   0xf   : > { %s2229_s0 = scalar_select %p1759_p6, 1, 0 }
  0x10   : > { %p466_p8 = scmp.lt.s32.totalorder %s1610_s22, 3 }
  0x11   : > { %2230 = sst [smem:[#allocation8_spill]] %s2229_s0 }
  0x12   : > { %p467_p9 = pnand %p1386_p7, %p466_p8 }
  0x13   : > { %s1388_s30 = sshll.u32 (!%p467_p9), %s1738_s23, 1  ;;  %v536_v0 = vlaneseq (!%p467_p9)  ;;  %v1612_v1 = vmov (!%p467_p9), 1983009808   ;;  %v1613_v3 = vmov (!%p467_p9), 0   ;;  %v611_v5 = vld [vmem:[%s2207_s5] sm:$0xff] (!%p467_p9)  ;;  %v612_v8 = vld [vmem:[%s2207_s5 + $0x8] sm:$0xff] (!%p467_p9) }
  0x14   : > { %470 = sbr.rel (%p467_p9) target bundleno = 1271 (0x4f7), region = 84  ;;  %p517_p10 = scmp.lt.s32.totalorder (!%p467_p9), %s1388_s30, 3  ;;  %v534_v2 = vunpack.c.l.s4 (!%p467_p9), %v1612_v1  ;;  %584 = vmatprep.mubr.bf16.mxu0 (!%p467_p9), %v1613_v3  ;;  %1484 = vset.pattern.permute.xlu1 (!%p467_p9), %v1613_v3  ;;  %v595_v6 = vld [vmem:[%s2206_s4] sm:$0xff] (!%p467_p9)  ;;  %v596_v9 = vld [vmem:[%s2206_s4 + $0x8] sm:$0xff] (!%p467_p9)  ;;  %vm545_vm0 = vcmask (!%p467_p9), 1041408   ;;  %v1614_v17 = vmov (!%p467_p9), 1  }
  0x15   : > { %v1769_v4 = vshrl.u32 (!%p467_p9), %v536_v0, 7  ;;  %1483 = vset.pattern.permute.xlu0 (!%p467_p9), %v1613_v3  ;;  %615 = vperm.xlu1 (!%p467_p9), %1484, %v611_v5   ;;  %s2231_s0 = sld [smem:[#allocation9_spill]] (!%p467_p9)  ;;  %v656_v13 = vld [vmem:[%s2208_s6 + $0x8] sm:$0xff] (!%p467_p9)  ;;  %v655_v14 = vld [vmem:[%s2208_s6] sm:$0xff] (!%p467_p9)  ;;  %s2232_s3 = sld [smem:[#allocation10_spill]] (!%p467_p9)  ;;  %vm541_vm1 = vcmask (!%p467_p9), 31744  }
  0x16   : > { %v535_v7 = vunpack.c.0.s8 (!%p467_p9), %v534_v2  ;;  %599 = vperm.xlu0 (!%p467_p9), %1483, %v595_v6   ;;  %v1615_v19 = vmov (!%p467_p9), 2   ;;  %v1616_v20 = vmov (!%p467_p9), 3   ;;  %v1617_v21 = vmov (!%p467_p9), 4   ;;  %v1400_v62 = vld [vmem:[%s2203_s1 + $0x4] ss:$8 sm:$0x3] (!%p467_p9) }
  0x17   : > { %v1618_v22 = vmov (!%p467_p9), 5   ;;  %v1619_v23 = vmov (!%p467_p9), 6   ;;  %v1620_v24 = vmov (!%p467_p9), 7   ;;  %v1621_v25 = vmov (!%p467_p9), 8   ;;  %s1623_s18 = smov (!%p467_p9), 17   ;;  %s1625_s24 = smov (!%p467_p9), 15  }
  0x18   : > { %v538_v10 = vsub.s32 (!%p467_p9), %v535_v7, %v1769_v4  ;;  %v1814_v59 = vsub.s32 (!%p467_p9), 0, %v1769_v4  ;;  %v1817_v60 = vsub.s32 (!%p467_p9), 1, %v1769_v4  ;;  %s1626_s26 = smov (!%p467_p9), 1   ;;  %s1627_s21 = smov (!%p467_p9), 127   ;;  %vm1198_vm10 = vcmask (!%p467_p9), 130048  }
  0x19   : > { %620 = vperm.xlu1 (!%p467_p9), %1484, %v612_v8   ;;  %s1628_s28 = smov (!%p467_p9), 113   ;;  %s1629_s25 = smov (!%p467_p9), 112  }
  0x1a   : > { %604 = vperm.xlu0 (!%p467_p9), %1483, %v596_v9   ;;  %v850_v1 = vrot.slane (!%p467_p9), %v1400_v62, %v1814_v59 }
  0x1b   : > { %s2240_s30 = smov (!%p517_p10, %s1388_s30), 3  ;;  %v1503_v18 = vld [vmem:[%s2232_s3] sm:$0xff]  }
  0x1c   : > { %s1389_s17 = sshll.u32 %s2240_s30, 1 }
  0x1d   : > { %s520_s19 = scalar_lea.vmem %s2231_s0, %s1389_s17  ;;  %695 = vperm.xlu1 %1484, %v656_v13   ;;  %s1622_s17 = smov 16  }
  0x1e   : > { %v1788_v11 = vld [vmem:[%s520_s19] sm:$0xf]  ;;  %1485 = vset.pattern.permute.xlu0 %v1614_v17  ;;  %s1624_s19 = smov 111  }
  0x1f   : > { %v539_v12 = vrot.slane %v1788_v11, %v538_v10  ;;  %737 = vperm.xlu0 %1485, %v655_v14  }
  0x21   : > { %v540_v15 = vcombine.high %v539_v12, %v539_v12  ;;  %v547_v16 = vsel %vm545_vm0, %v539_v12, 0  ;;  %1486 = vset.pattern.permute.xlu1 %v1614_v17 }
  0x22   : > { %741 = vperm.xlu1 %1486, %v656_v13  }
  0x23   : > { %1391 = vmatprep.subr.msk.bf16.mxu0 %vm545_vm0, %v540_v15  ;;  %1488 = vset.pattern.permute.xlu0 %v1615_v19 }
  0x24   : > { %553 = vmatpush1.bf16.msra.mxu0 %v547_v16  ;;  %787 = vperm.xlu0 %1488, %v656_v13  }
  0x26   : > { %1487 = vset.pattern.permute.xlu1 %v1615_v19 }
  0x27   : > { %1392 = vmatmul.mubr.msk.bf16.vlgmr.msra.gmra.mrb[0].mxu0 %vm541_vm1, %v1503_v18  ;;  %783 = vperm.xlu1 %1487, %v655_v14  }
  0x28   : > { %1489 = vset.pattern.permute.xlu0 %v1616_v20 }
  0x29   : > { %829 = vperm.xlu0 %1489, %v655_v14  }
  0x2b   : > { %1490 = vset.pattern.permute.xlu1 %v1616_v20 }
  0x2c   : > { %833 = vperm.xlu1 %1490, %v656_v13  }
  0x2d   : > { %1492 = vset.pattern.permute.xlu0 %v1617_v21 }
  0x2e   : > { %866 = vperm.xlu0 %1492, %v656_v13  }
  0x30   : > { %1491 = vset.pattern.permute.xlu1 %v1617_v21 }
  0x31   : > { %862 = vperm.xlu1 %1491, %v655_v14  }
  0x32   : > { %1493 = vset.pattern.permute.xlu0 %v1618_v22 }
  0x33   : > { %908 = vperm.xlu0 %1493, %v655_v14  }
  0x35   : > { %1494 = vset.pattern.permute.xlu1 %v1618_v22  ;;  %v1061_v22 = vld [vmem:[%s2209_s7] sm:$0xff] }
  0x36   : > { %912 = vperm.xlu1 %1494, %v656_v13  }
  0x37   : > { %1496 = vset.pattern.permute.xlu0 %v1619_v23 }
  0x38   : > { %958 = vperm.xlu0 %1496, %v656_v13  }
  0x3a   : > { %1495 = vset.pattern.permute.xlu1 %v1619_v23  ;;  %v1078_v23 = vld [vmem:[%s2210_s8 + $0x8] sm:$0xff] }
  0x3b   : > { %954 = vperm.xlu1 %1495, %v655_v14  }
  0x3c   : > { %1497 = vset.pattern.permute.xlu0 %v1620_v24 }
  0x3d   : > { %1000 = vperm.xlu0 %1497, %v655_v14  }
  0x3f   : > { %1498 = vset.pattern.permute.xlu1 %v1620_v24  ;;  %v1062_v24 = vld [vmem:[%s2209_s7 + $0x8] sm:$0xff] }
  0x40   : > { %1004 = vperm.xlu1 %1498, %v656_v13  }
  0x41   : > { %1500 = vset.pattern.permute.xlu0 %v1621_v25 }
  0x42   : > { %1050 = vperm.xlu0 %1500, %v656_v13  }
  0x44   : > { %1499 = vset.pattern.permute.xlu1 %v1621_v25  ;;  %v1077_v25 = vld [vmem:[%s2210_s8] sm:$0xff] }
  0x45   : > { %1046 = vperm.xlu1 %1499, %v655_v14  }
  0x46   : > { %1501 = vset.pattern.permute.xlu0 %v1613_v3 }
  0x47   : > { %690 = vperm.xlu0 %1501, %v655_v14  }
  0x49   : > { %1502 = vset.pattern.permute.xlu1 %v1613_v3  ;;  %v854_v3 = vrot.slane %v1400_v62, %v1817_v60  ;;  %v1401_v62 = vld [vmem:[%s2203_s1 + $0x5] ss:$8 sm:$0x3] }
  0x94   : > { %v616_v27 = vpop.permute.xlu1 %615 }
  0x95   : > { %v600_v26 = vpop.permute.xlu0 %599 }
  0x98   : > { %v621_v37 = vpop.permute.xlu1 %620 }
  0x99   : > { %v605_v31 = vpop.permute.xlu0 %604 }
  0x9c   : > { %v1803_v46 = vpop.permute.xlu1 %695 }
  0x9e   : > { %v1807_v48 = vpop.permute.xlu0 %737 }
  0xa1   : > { %v1805_v47 = vpop.permute.xlu1 %741 }
  0xa3   : > { %v1811_v58 = vpop.permute.xlu0 %787 }
  0xa6   : > { %v1809_v56 = vpop.permute.xlu1 %783 }
  0xa8   : > { %v1824_v63 = vpop.permute.xlu0 %829 }
  0xab   : > { %v1819_v61 = vpop.permute.xlu1 %833 }
  0xad   : > { %v867_v15 = vpop.permute.xlu0 %866 }
  0xb0   : > { %v863_v9 = vpop.permute.xlu1 %862 }
  0xfa   : > { %v586_v28 = vpop.f32.mrb[0].mxu0 }
  0xfb   : > { %v607_v29 = vmul.f32 %v600_v26, %v586_v28  ;;  %v588_v30 = vpop.f32.mrb[1].mxu0 }
  0xfc   : > { %v608_v32 = vmul.f32 %v600_v26, %v588_v30  ;;  %v590_v33 = vpop.f32.mrb[2].mxu0  ;;  %v1868_v26 = vpop.permute.xlu0 %908 }
  0xfd   : > { %v623_v34 = vadd.f32 %v616_v27, %v607_v29  ;;  %v609_v35 = vmul.f32 %v605_v31, %v590_v33  ;;  %v592_v36 = vpop.f32.mrb[3].mxu0 }
  0xfe   : > { %v624_v38 = vadd.f32 %v616_v27, %v608_v32  ;;  %v610_v39 = vmul.f32 %v605_v31, %v592_v36  ;;  %v1870_v27 = vpop.permute.xlu1 %912 }
  0xff   : > { %v1393_v40 = vmul.f32 -1.442695, %v623_v34  ;;  %v625_v41 = vadd.f32 %v621_v37, %v609_v35 }
 0x100   : > { %v1394_v42 = vmul.f32 -1.442695, %v624_v38  ;;  %v626_v43 = vadd.f32 %v621_v37, %v610_v39  ;;  %v1872_v28 = vpop.permute.xlu0 %958  ;;  %v1885_v37 = vand.u32 127, %v536_v0 }
 0x101   : > { %1504 = vpow2.f32 %v1393_v40  ;;  %v1395_v44 = vmul.f32 -1.442695, %v625_v41 }
 0x102   : > { %1506 = vpow2.f32 %v1394_v42  ;;  %v1396_v45 = vmul.f32 -1.442695, %v626_v43  ;;  %v1874_v29 = vpop.permute.xlu1 %954  ;;  %vm667_vm2 = vcmp.lt.s32.totalorder %v1885_v37, 17  ;;  %v1397_v42 = vld [vmem:[%s2203_s1 + $0x1] ss:$8 sm:$0x3] }
 0x103   : > { %1508 = vpow2.f32 %v1395_v44  ;;  %vm714_vm3 = vcmp.lt.s32.totalorder %v1885_v37, 16  ;;  %vm806_vm4 = vcmp.lt.s32.totalorder %v1885_v37, 1  ;;  %vm885_vm5 = vcmp.lt.s32.totalorder %v1885_v37, 127 }
 0x104   : > { %1510 = vpow2.f32 %v1396_v45  ;;  %v1876_v30 = vpop.permute.xlu0 %1000  ;;  %vm760_vm6 = vcmp.lt.s32.totalorder %v1885_v37, 15  ;;  %vm977_vm7 = vcmp.lt.s32.totalorder %v1885_v37, 112  ;;  %vm931_vm8 = vcmp.lt.s32.totalorder %v1885_v37, 113 }
 0x105   : > { %vm1023_vm9 = vcmp.lt.s32.totalorder %v1885_v37, 111 }
 0x106   : > { %v1878_v31 = vpop.permute.xlu1 %1004 }
 0x108   : > { %v1880_v32 = vpop.permute.xlu0 %1050 }
 0x10a   : > { %v1882_v33 = vpop.permute.xlu1 %1046 }
 0x10b   : > { %v1505_v49 = vpop.eup %1504 }
 0x10c   : > { %v1507_v50 = vpop.eup %1506  ;;  %v639_v51 = vadd.f32 1.0, %v1505_v49  ;;  %v1904_v49 = vrot.slane %v1397_v42, %v1817_v60 }
 0x10d   : > { %v1509_v52 = vpop.eup %1508  ;;  %v640_v53 = vadd.f32 1.0, %v1507_v50  ;;  %v1399_v50 = vld [vmem:[%s2203_s1 + $0x3] ss:$8 sm:$0x3] }
 0x10e   : > { %v1511_v54 = vpop.eup %1510  ;;  %1512 = vrcp.f32 %v639_v51  ;;  %v641_v55 = vadd.f32 1.0, %v1509_v52 }
 0x10f   : > { %1514 = vrcp.f32 %v640_v53  ;;  %v642_v57 = vadd.f32 1.0, %v1511_v54 }
 0x110   : > { %1516 = vrcp.f32 %v641_v55  ;;  %v1914_v55 = vrot.slane %v1399_v50, %v1814_v59 }
 0x111   : > { %1518 = vrcp.f32 %v642_v57  ;;  %v1917_v57 = vrot.slane %v1399_v50, %v1817_v60  ;;  %v1970_v50 = vrot.slane %v1401_v62, %v1814_v59 }
 0x118   : > { %v1513_v2 = vpop.eup %1512 }
 0x119   : > { %v1515_v5 = vpop.eup %1514  ;;  %v651_v6 = vmul.f32 %v1513_v2, %v623_v34  ;;  %v691_v34 = vpop.permute.xlu0 %690 }
 0x11a   : > { %v1517_v7 = vpop.eup %1516  ;;  %v652_v8 = vmul.f32 %v1515_v5, %v624_v38  ;;  %v672_v38 = vld [vmem:[%s2203_s1] ss:$8 sm:$0x3] }
 0x11b   : > { %v1519_v4 = vpop.eup %1518  ;;  %v653_v10 = vmul.f32 %v1517_v7, %v625_v41  ;;  %706 = vrot.lane.b32.xlu0 %v651_v6, %s1622_s17  ;;  %657 = vrot.lane.b32.xlu1 %v651_v6, %s1623_s18  ;;  %v857_v12 = vmul.f32 %v850_v1, %v651_v6  ;;  %v1894_v41 = vrot.slane %v672_v38, %v1817_v60 }
 0x11c   : > { %v654_v13 = vmul.f32 %v1519_v4, %v626_v43  ;;  %v858_v14 = vmul.f32 %v854_v3, %v652_v8 }
 0x11d   : > { %v1830_v16 = vmul.f32 %v863_v9, %v857_v12  ;;  %v859_v17 = vmul.f32 %v850_v1, %v653_v10  ;;  %v1923_v1 = vrot.slane %v672_v38, %v1814_v59 }
 0x11e   : > { %v1832_v18 = vmul.f32 %v863_v9, %v858_v14  ;;  %v860_v19 = vmul.f32 %v854_v3, %v654_v13  ;;  %v1926_v3 = vrot.slane %v1397_v42, %v1814_v59 }
 0x11f   : > { %v1834_v20 = vmul.f32 %v867_v15, %v859_v17  ;;  %1015 = vrot.lane.b32.xlu0 %v651_v6, %s1624_s19  ;;  %752 = vrot.lane.b32.xlu1 %v651_v6, %s1625_s24  ;;  %v1398_v17 = vld [vmem:[%s2203_s1 + $0x2] ss:$8 sm:$0x3] }
 0x120   : > { %v1837_v21 = vmul.f32 %v867_v15, %v860_v19  ;;  %v1403_v19 = vld [vmem:[%s2203_s1 + $0x7] ss:$8 sm:$0x3]  ;;  %v1957_v42 = vrot.slane %v1398_v17, %v1814_v59 }
 0x123   : > { %798 = vrot.lane.b32.xlu1 %v651_v6, %s1626_s26  ;;  %661 = vrot.lane.b32.xlu0 %v652_v8, %s1623_s18 }
 0x127   : > { %877 = vrot.lane.b32.xlu1 %v651_v6, %s1627_s21  ;;  %710 = vrot.lane.b32.xlu0 %v652_v8, %s1622_s17 }
 0x12b   : > { %923 = vrot.lane.b32.xlu1 %v651_v6, %s1628_s28  ;;  %802 = vrot.lane.b32.xlu0 %v652_v8, %s1626_s26 }
 0x12f   : > { %969 = vrot.lane.b32.xlu1 %v651_v6, %s1629_s25  ;;  %881 = vrot.lane.b32.xlu0 %v652_v8, %s1627_s21 }
 0x133   : > { %756 = vrot.lane.b32.xlu1 %v652_v8, %s1625_s24  ;;  %973 = vrot.lane.b32.xlu0 %v652_v8, %s1629_s25 }
 0x137   : > { %927 = vrot.lane.b32.xlu1 %v652_v8, %s1628_s28  ;;  %754 = vrot.lane.b32.xlu0 %v653_v10, %s1625_s24 }
 0x13b   : > { %925 = vrot.lane.b32.xlu0 %v653_v10, %s1628_s28  ;;  %659 = vrot.lane.b32.xlu1 %v653_v10, %s1623_s18 }
 0x13f   : > { %708 = vrot.lane.b32.xlu1 %v653_v10, %s1622_s17  ;;  %758 = vrot.lane.b32.xlu0 %v654_v13, %s1625_s24 }
 0x143   : > { %800 = vrot.lane.b32.xlu1 %v653_v10, %s1626_s26  ;;  %1019 = vrot.lane.b32.xlu0 %v652_v8, %s1624_s19 }
 0x147   : > { %879 = vrot.lane.b32.xlu1 %v653_v10, %s1627_s21  ;;  %929 = vrot.lane.b32.xlu0 %v654_v13, %s1628_s28 }
 0x14b   : > { %971 = vrot.lane.b32.xlu1 %v653_v10, %s1629_s25  ;;  %1065 = vperm.xlu0 %1501, %v1061_v22  }
 0x14f   : > { %1017 = vrot.lane.b32.xlu1 %v653_v10, %s1624_s19  ;;  %1086 = vperm.xlu0 %1501, %v1078_v23   ;;  %v1937_v10 = vrot.slane %v1401_v62, %v1817_v60 }
 0x153   : > { %663 = vrot.lane.b32.xlu1 %v654_v13, %s1623_s18 }
 0x157   : > { %712 = vrot.lane.b32.xlu1 %v654_v13, %s1622_s17  ;;  %s513_s17 = sand.u32 1, %s1602_s2  }
 0x158   : > { %s1387_s18 = sshll.u32 %s513_s17, 2  ;;  %s1310_s24 = scalar_lea.sflag [#allocation3], %s513_s17 }
 0x15b   : > { %804 = vrot.lane.b32.xlu1 %v654_v13, %s1626_s26  ;;  %s515_s26 = scalar_lea.vmem [#allocation2], %s1387_s18 }
 0x15f   : > { %883 = vrot.lane.b32.xlu1 %v654_v13, %s1627_s21  ;;  %s1324_s21 = sshll.u32 %s515_s26, 4  ;;  %s2162_s21 = int_to_ptr.vmem [resolvable:$true] %s1324_s21 }
 0x160   : > { %s1548_s28 = scalar_lea.vmem %s2162_s21, 64 }
 0x161   : > { %p1549_p11 = scmp.ne.s32.totalorder %s2162_s21, %s1548_s28 }
 0x163   : > { %1070 = vperm.xlu1 %1502, %v1062_v24   ;;  %p1550_p12 = pnand %p1549_p11, %p1755_p5 }
 0x165   : > { %p1551_p13 = pneg %p1550_p12 }
 0x167   : > { %975 = vrot.lane.b32.xlu1 %v654_v13, %s1629_s25 }
 0x16b   : > { %1021 = vrot.lane.b32.xlu1 %v654_v13, %s1624_s19  ;;  %s1420_s19 = sshll.u32 %s1738_s23, 6  ;;  %s1631_s23 = smov [#allocation2]  }
 0x16c   : > { %s2160_s27 = scalar_lea.hbm %s2218_s16, %s1420_s19  ;;  %s1552_s3 = sshll.u32 %s1631_s23, 4  ;;  %s1553_s3 = int_to_ptr.vmem [resolvable:$false] %s1552_s3 }
 0x16d   : > { %s1554_s0 = scalar_lea.vmem %s1553_s3, 128  ;;  %p1555_p0 = scmp.lt.s32.totalorder %s2162_s21, %s1553_s3 }
 0x16e   : > { %p1556_p1 = scmp.lt.s32.totalorder %s1554_s0, %s1548_s28 }
 0x16f   : > { %1081 = vperm.xlu1 %1502, %v1077_v25  }
 0x170   : > { %p1557_p2 = por %p1556_p1, %p1555_p0 }
 0x172   : > { %p1558_p3 = pnand %p1557_p2, %p1551_p13 }
 0x18d   : > { %v707_v35 = vpop.permute.xlu0 %706  ;;  %v658_v36 = vpop.permute.xlu1 %657 }
 0x191   : > { %v1890_v39 = vpop.permute.xlu0 %1015  ;;  %v753_v40 = vpop.permute.xlu1 %752 }
 0x195   : > { %v799_v43 = vpop.permute.xlu1 %798  ;;  %v662_v44 = vpop.permute.xlu0 %661 }
 0x196   : > { %v668_v0 = vsel %vm667_vm2, %v658_v36, %v662_v44  ;;  %v670_v12 = vsel %vm667_vm2, %v662_v44, %v658_v36 }
 0x197   : > { %v685_v45 = vmul.f32 %v1894_v41, %v668_v0  ;;  %v684_v36 = vmul.f32 %v1923_v1, %v670_v12  ;;  %v1966_v0 = vrot.slane %v1403_v19, %v1817_v60 }
 0x199   : > { %v878_v51 = vpop.permute.xlu1 %877  ;;  %v711_v52 = vpop.permute.xlu0 %710  ;;  %v699_v2 = vmul.f32 %v691_v34, %v685_v45 }
 0x19a   : > { %v715_v53 = vsel %vm714_vm3, %v707_v35, %v711_v52  ;;  %v717_v8 = vsel %vm714_vm3, %v711_v52, %v707_v35 }
 0x19b   : > { %v733_v54 = vmul.f32 %v1904_v49, %v715_v53  ;;  %v732_v22 = vmul.f32 %v1926_v3, %v717_v8 }
 0x19d   : > { %v745_v5 = vmul.f32 %v1807_v48, %v733_v54  ;;  %v924_v6 = vpop.permute.xlu1 %923  ;;  %v803_v7 = vpop.permute.xlu0 %802  ;;  %v744_v45 = vmul.f32 %v1807_v48, %v732_v22 }
 0x19e   : > { %v807_v9 = vsel %vm806_vm4, %v799_v43, %v803_v7  ;;  %v809_v4 = vsel %vm806_vm4, %v803_v7, %v799_v43  ;;  %v1402_v43 = vld [vmem:[%s2203_s1 + $0x6] ss:$8 sm:$0x3] }
 0x19f   : > { %v749_v13 = vadd.f32 %v745_v5, %v699_v2  ;;  %v824_v14 = vmul.f32 %v1914_v55, %v809_v4  ;;  %v825_v15 = vmul.f32 %v1917_v57, %v807_v9  ;;  %v1974_v54 = vrot.slane %v1402_v43, %v1817_v60 }
 0x1a0   : > { %v698_v2 = vmul.f32 %v691_v34, %v684_v36  ;;  %v1993_v36 = vrot.slane %v1403_v19, %v1814_v59 }
 0x1a1   : > { %v836_v23 = vmul.f32 %v1824_v63, %v824_v14  ;;  %v837_v24 = vmul.f32 %v1824_v63, %v825_v15  ;;  %v970_v25 = vpop.permute.xlu1 %969  ;;  %v882_v35 = vpop.permute.xlu0 %881  ;;  %v775_v63 = vrot.slane %v1398_v17, %v1817_v60  ;;  %v1989_v15 = vrot.slane %v1402_v43, %v1814_v59 }
 0x1a2   : > { %v888_v38 = vsel %vm885_vm5, %v882_v35, %v878_v51  ;;  %v886_v62 = vsel %vm885_vm5, %v878_v51, %v882_v35  ;;  %v748_v12 = vadd.f32 %v744_v45, %v698_v2 }
 0x1a3   : > { %v904_v44 = vmul.f32 %v1937_v10, %v888_v38  ;;  %v903_v22 = vmul.f32 %v1970_v50, %v886_v62 }
 0x1a5   : > { %v757_v52 = vpop.permute.xlu1 %756  ;;  %v974_v53 = vpop.permute.xlu0 %973  ;;  %v915_v62 = vmul.f32 %v1868_v26, %v903_v22 }
 0x1a6   : > { %v761_v5 = vsel %vm760_vm6, %v753_v40, %v757_v52  ;;  %v763_v7 = vsel %vm760_vm6, %v757_v52, %v753_v40  ;;  %v980_v48 = vsel %vm977_vm7, %v974_v53, %v970_v25 }
 0x1a7   : > { %v778_v8 = vmul.f32 %v1957_v42, %v763_v7  ;;  %v779_v9 = vmul.f32 %v775_v63, %v761_v5  ;;  %v996_v4 = vmul.f32 %v1966_v0, %v980_v48 }
 0x1a9   : > { %v790_v34 = vmul.f32 %v1809_v56, %v778_v8  ;;  %v791_v14 = vmul.f32 %v1809_v56, %v779_v9  ;;  %v928_v40 = vpop.permute.xlu1 %927  ;;  %v755_v17 = vpop.permute.xlu0 %754  ;;  %v978_v56 = vsel %vm977_vm7, %v970_v25, %v974_v53  ;;  %v916_v8 = vmul.f32 %v1868_v26, %v904_v44  ;;  %v1404_v25 = vld [vmem:[%s2203_s1 + $0x10] ss:$8 sm:$0x3] }
 0x1aa   : > { %v932_v51 = vsel %vm931_vm8, %v924_v6, %v928_v40  ;;  %v934_v35 = vsel %vm931_vm8, %v928_v40, %v924_v6  ;;  %v995_v48 = vmul.f32 %v1993_v36, %v978_v56  ;;  %v2021_v44 = vrot.slane %v1404_v25, %v1817_v60 }
 0x1ab   : > { %v794_v38 = vadd.f32 %v790_v34, %v748_v12  ;;  %v795_v45 = vadd.f32 %v791_v14, %v749_v13  ;;  %v950_v43 = vmul.f32 %v1974_v54, %v934_v35  ;;  %v949_v5 = vmul.f32 %v1989_v15, %v932_v51 }
 0x1ac   : > { %v1007_v26 = vmul.f32 %v1876_v30, %v995_v48  ;;  %v1008_v14 = vmul.f32 %v1876_v30, %v996_v4 }
 0x1ad   : > { %v840_v52 = vadd.f32 %v836_v23, %v794_v38  ;;  %v841_v2 = vadd.f32 %v837_v24, %v795_v45  ;;  %v926_v7 = vpop.permute.xlu0 %925  ;;  %v660_v19 = vpop.permute.xlu1 %659  ;;  %v961_v53 = vmul.f32 %v1874_v29, %v949_v5  ;;  %v962_v9 = vmul.f32 %v1874_v29, %v950_v43 }
 0x1af   : > { %v873_v6 = vadd.f32 %v1830_v16, %v840_v52  ;;  %v874_v13 = vadd.f32 %v1832_v18, %v841_v2  ;;  %v2018_v18 = vrot.slane %v1404_v25, %v1814_v59 }
 0x1b1   : > { %v919_v23 = vadd.f32 %v915_v62, %v873_v6  ;;  %v920_v24 = vadd.f32 %v916_v8, %v874_v13  ;;  %v709_v12 = vpop.permute.xlu1 %708  ;;  %v759_v34 = vpop.permute.xlu0 %758 }
 0x1b2   : > { %v762_v16 = vsel %vm760_vm6, %v755_v17, %v759_v34  ;;  %v764_v13 = vsel %vm760_vm6, %v759_v34, %v755_v17 }
 0x1b3   : > { %v965_v40 = vadd.f32 %v961_v53, %v919_v23  ;;  %v966_v22 = vadd.f32 %v962_v9, %v920_v24  ;;  %v781_v51 = vmul.f32 %v775_v63, %v762_v16 }
 0x1b5   : > { %v801_v35 = vpop.permute.xlu1 %800  ;;  %v1020_v29 = vpop.permute.xlu0 %1019  ;;  %v1011_v38 = vadd.f32 %v1007_v26, %v965_v40  ;;  %v1012_v45 = vadd.f32 %v1008_v14, %v966_v22  ;;  %v793_v22 = vmul.f32 %v1811_v58, %v781_v51 }
 0x1b6   : > { %v1024_v56 = vsel %vm1023_vm9, %v1890_v39, %v1020_v29  ;;  %v1026_v43 = vsel %vm1023_vm9, %v1020_v29, %v1890_v39 }
 0x1b7   : > { %v1041_v60 = vmul.f32 %v2018_v18, %v1024_v56  ;;  %v1042_v52 = vmul.f32 %v2021_v44, %v1026_v43 }
 0x1b9   : > { %v1053_v30 = vmul.f32 %v1882_v33, %v1041_v60  ;;  %v1054_v63 = vmul.f32 %v1882_v33, %v1042_v52  ;;  %v880_v4 = vpop.permute.xlu1 %879  ;;  %v930_v2 = vpop.permute.xlu0 %929 }
 0x1ba   : > { %v935_v5 = vsel %vm931_vm8, %v930_v2, %v926_v7 }
 0x1bb   : > { %v952_v48 = vmul.f32 %v1974_v54, %v935_v5  ;;  %v2037_v62 = vadd.f32 %v1053_v30, %v1011_v38  ;;  %v2039_v8 = vadd.f32 %v1054_v63, %v1012_v45  ;;  %v780_v54 = vmul.f32 %v1957_v42, %v764_v13 }
 0x1bd   : > { %v972_v39 = vpop.permute.xlu1 %971  ;;  %v792_v14 = vmul.f32 %v1811_v58, %v780_v54  ;;  %v964_v13 = vmul.f32 %v1872_v28, %v952_v48 }
 0x1c1   : > { %v1018_v6 = vpop.permute.xlu1 %1017 }
 0x1c5   : > { %v664_v25 = vpop.permute.xlu1 %663 }
 0x1c6   : > { %v669_v33 = vsel %vm667_vm2, %v660_v19, %v664_v25  ;;  %v671_v23 = vsel %vm667_vm2, %v664_v25, %v660_v19 }
 0x1c7   : > { %v687_v24 = vmul.f32 %v1894_v41, %v669_v33  ;;  %v686_v53 = vmul.f32 %v1923_v1, %v671_v23 }
 0x1c9   : > { %v713_v9 = vpop.permute.xlu1 %712  ;;  %v700_v19 = vmul.f32 %v1803_v46, %v686_v53  ;;  %v701_v41 = vmul.f32 %v1803_v46, %v687_v24 }
 0x1ca   : > { %v716_v26 = vsel %vm714_vm3, %v709_v12, %v713_v9  ;;  %v718_v17 = vsel %vm714_vm3, %v713_v9, %v709_v12  ;;  %v933_v12 = vsel %vm931_vm8, %v926_v7, %v930_v2  ;;  %v1066_v54 = vpop.permute.xlu0 %1065 }
 0x1cb   : > { %v734_v34 = vmul.f32 %v1926_v3, %v718_v17  ;;  %v735_v16 = vmul.f32 %v1904_v49, %v716_v26  ;;  %v951_v7 = vmul.f32 %v1989_v15, %v933_v12 }
 0x1cd   : > { %v746_v42 = vmul.f32 %v1805_v47, %v734_v34  ;;  %v747_v1 = vmul.f32 %v1805_v47, %v735_v16  ;;  %v805_v40 = vpop.permute.xlu1 %804  ;;  %v963_v5 = vmul.f32 %v1872_v28, %v951_v7  ;;  %v1074_v16 = vmul.f32 %v1066_v54, %v2039_v8 }
 0x1ce   : > { %v808_v3 = vsel %vm806_vm4, %v801_v35, %v805_v40  ;;  %v810_v49 = vsel %vm806_vm4, %v805_v40, %v801_v35 }
 0x1cf   : > { %v750_v29 = vadd.f32 %v746_v42, %v700_v19  ;;  %v751_v38 = vadd.f32 %v747_v1, %v701_v41  ;;  %v826_v46 = vmul.f32 %v1914_v55, %v810_v49  ;;  %v827_v45 = vmul.f32 %v1917_v57, %v808_v3 }
 0x1d1   : > { %v796_v56 = vadd.f32 %v792_v14, %v750_v29  ;;  %v797_v47 = vadd.f32 %v793_v22, %v751_v38  ;;  %v838_v43 = vmul.f32 %v1819_v61, %v826_v46  ;;  %v839_v58 = vmul.f32 %v1819_v61, %v827_v45  ;;  %v884_v51 = vpop.permute.xlu1 %883 }
 0x1d2   : > { %v887_v60 = vsel %vm885_vm5, %v880_v4, %v884_v51  ;;  %v889_v35 = vsel %vm885_vm5, %v884_v51, %v880_v4 }
 0x1d3   : > { %v842_v52 = vadd.f32 %v838_v43, %v796_v56  ;;  %v843_v30 = vadd.f32 %v839_v58, %v797_v47  ;;  %v905_v55 = vmul.f32 %v1970_v50, %v887_v60  ;;  %v906_v57 = vmul.f32 %v1937_v10, %v889_v35 }
 0x1d5   : > { %v875_v63 = vadd.f32 %v1834_v20, %v842_v52  ;;  %v876_v2 = vadd.f32 %v1837_v21, %v843_v30  ;;  %v917_v61 = vmul.f32 %v1870_v27, %v905_v55  ;;  %v918_v15 = vmul.f32 %v1870_v27, %v906_v57 }
 0x1d7   : > { %v921_v25 = vadd.f32 %v917_v61, %v875_v63  ;;  %v922_v4 = vadd.f32 %v918_v15, %v876_v2  ;;  %v1130_v61 = vld [vmem:[%s2211_s9] sm:$0xff]  ;;  %v1131_v15 = vld [vmem:[%s2211_s9 + $0x8] sm:$0xff] }
 0x1d9   : > { %v967_v33 = vadd.f32 %v963_v5, %v921_v25  ;;  %v968_v23 = vadd.f32 %v964_v13, %v922_v4 }
 0x1e2   : > { %v1071_v24 = vpop.permute.xlu1 %1070 }
 0x1e6   : > { %v976_v50 = vpop.permute.xlu1 %975 }
 0x1e7   : > { %v979_v10 = vsel %vm977_vm7, %v972_v39, %v976_v50  ;;  %v981_v20 = vsel %vm977_vm7, %v976_v50, %v972_v39 }
 0x1e8   : > { %v997_v21 = vmul.f32 %v1993_v36, %v979_v10  ;;  %v998_v27 = vmul.f32 %v1966_v0, %v981_v20  ;;  %v1073_v0 = vmul.f32 %v1066_v54, %v2037_v62  ;;  %v1143_v54 = vld [vmem:[%s2212_s10] sm:$0x1] }
 0x1ea   : > { %v1009_v53 = vmul.f32 %v1878_v31, %v997_v21  ;;  %v1010_v28 = vmul.f32 %v1878_v31, %v998_v27  ;;  %v1022_v48 = vpop.permute.xlu1 %1021 }
 0x1eb   : > { %v1025_v9 = vsel %vm1023_vm9, %v1018_v6, %v1022_v48  ;;  %v1027_v26 = vsel %vm1023_vm9, %v1022_v48, %v1018_v6 }
 0x1ec   : > { %v1013_v17 = vadd.f32 %v1009_v53, %v967_v33  ;;  %v1014_v34 = vadd.f32 %v1010_v28, %v968_v23  ;;  %v1043_v39 = vmul.f32 %v2018_v18, %v1025_v9  ;;  %v1044_v36 = vmul.f32 %v2021_v44, %v1027_v26  ;;  %v1087_v18 = vpop.permute.xlu0 %1086 }
 0x1ee   : > { %v1055_v14 = vmul.f32 %v1880_v32, %v1043_v39  ;;  %v1056_v31 = vmul.f32 %v1880_v32, %v1044_v36  ;;  %v1082_v19 = vpop.permute.xlu1 %1081  ;;  %v1153_v39 = vld [vmem:[%s2213_s11 + $0x8] sm:$0xff]  ;;  %v1152_v36 = vld [vmem:[%s2213_s11] sm:$0xff] }
 0x1ef   : > { %v1089_v41 = vadd.f32 %v1082_v19, %v1073_v0  ;;  %v1090_v42 = vadd.f32 %v1082_v19, %v1074_v16 }
 0x1f0   : > { %v1059_v1 = vadd.f32 %v1055_v14, %v1013_v17  ;;  %v1060_v37 = vadd.f32 %v1056_v31, %v1014_v34 }
 0x1f1   : > { %v1405_v6 = vmul.f32 -1.442695, %v1089_v41  ;;  %v1406_v40 = vmul.f32 -1.442695, %v1090_v42 }
 0x1f2   : > { %v1075_v22 = vmul.f32 %v1071_v24, %v1059_v1  ;;  %v1076_v12 = vmul.f32 %v1071_v24, %v1060_v37 }
 0x1f3   : > { %1520 = vpow2.f32 %v1405_v6 }
 0x1f4   : > { %1522 = vpow2.f32 %v1406_v40  ;;  %v1091_v44 = vadd.f32 %v1087_v18, %v1075_v22  ;;  %v1092_v62 = vadd.f32 %v1087_v18, %v1076_v12 }
 0x1f6   : > { %v1407_v3 = vmul.f32 -1.442695, %v1091_v44  ;;  %v1408_v8 = vmul.f32 -1.442695, %v1092_v62 }
 0x1f8   : > { %1524 = vpow2.f32 %v1407_v3 }
 0x1f9   : > { %1526 = vpow2.f32 %v1408_v8 }
 0x1fd   : > { %v1521_v49 = vpop.eup %1520 }
 0x1fe   : > { %v1523_v32 = vpop.eup %1522  ;;  %v1105_v29 = vadd.f32 1.0, %v1521_v49  ;;  %v1273_v49 = vld [vmem:[%s2216_s14] sm:$0xf] }
 0x1ff   : > { %v1106_v38 = vadd.f32 1.0, %v1523_v32  ;;  %v1281_v32 = vld [vmem:[%s2217_s15] sm:$0xf] }
 0x200   : > { %1528 = vrcp.f32 %v1105_v29  ;;  %v1630_v29 = vmov 0.0  }
 0x201   : > { %1530 = vrcp.f32 %v1106_v38  ;;  %1266 = vmatprep.mubr.f32.mxu1 %v1630_v29 }
 0x202   : > { %v1525_v46 = vpop.eup %1524 }
 0x203   : > { %v1527_v45 = vpop.eup %1526  ;;  %v1107_v56 = vadd.f32 1.0, %v1525_v46 }
 0x204   : > { %v1108_v47 = vadd.f32 1.0, %v1527_v45 }
 0x205   : > { %1532 = vrcp.f32 %v1107_v56 }
 0x206   : > { %1534 = vrcp.f32 %v1108_v47 }
 0x20a   : > { %v1529_v43 = vpop.eup %1528 }
 0x20b   : > { %v1531_v58 = vpop.eup %1530  ;;  %v2103_v51 = vmul.f32 %v1529_v43, %v1089_v41  ;;  %v1167_v41 = vld [vmem:[%s2214_s12 + $0x8] sm:$0xff] }
 0x20c   : > { %v2105_v7 = vmul.f32 %v1531_v58, %v1090_v42  ;;  %v1166_v42 = vld [vmem:[%s2214_s12] sm:$0xff] }
 0x20d   : > { %v1196_v58 = vld [vmem:[%s2215_s13] sm:$0x3] }
 0x20e   : > { %v1121_v60 = vadd.f32 %v2105_v7, %v2103_v51 }
 0x20f   : > { %v1533_v35 = vpop.eup %1532 }
 0x210   : > { %v1535_v52 = vpop.eup %1534  ;;  %1122 = vadd.xlane.f32.xlu1 %v1121_v60  ;;  %v2109_v30 = vmul.f32 %v1533_v35, %v1091_v44 }
 0x211   : > { %v2111_v55 = vmul.f32 %v1535_v52, %v1092_v62  ;;  %v1197_v52 = vunpack.c.l.bf16 %v1196_v58 }
 0x213   : > { %v1124_v57 = vadd.f32 %v2111_v55, %v2109_v30 }
 0x215   : > { %1125 = vadd.xlane.f32.xlu0 %v1124_v57 }
 0x29d   : > { %v1123_v63 = vpop.xlane.xlu1 %1122 }
 0x29e   : > { %v1128_v2 = vmul.f32 0.00390625, %v1123_v63 }
 0x2a0   : > { %v1132_v13 = vmul.f32 %v1130_v61, %v1128_v2 }
 0x2a2   : > { %v1126_v5 = vpop.xlane.xlu0 %1125  ;;  %v1134_v33 = vsel %vm541_vm1, %v1132_v13, 0.0 }
 0x2a3   : > { %v1129_v25 = vmul.f32 0.00390625, %v1126_v5 }
 0x2a5   : > { %v1133_v4 = vmul.f32 %v1131_v15, %v1129_v25 }
 0x2a7   : > { %v1135_v23 = vsel %vm541_vm1, %v1133_v4, 0.0 }
 0x2a8   : > { %v1136_v24 = vadd.f32 %v1135_v23, %v1134_v33 }
 0x2aa   : > { %v1137_v50 = vrot.slane %v1136_v24, 4 }
 0x2ac   : > { %v1138_v10 = vadd.f32 %v1137_v50, %v1136_v24 }
 0x2ae   : > { %v1139_v20 = vrot.slane %v1138_v10, 2 }
 0x2b0   : > { %v1140_v21 = vadd.f32 %v1139_v20, %v1138_v10 }
 0x2b2   : > { %v1141_v27 = vrot.slane %v1140_v21, 1 }
 0x2b4   : > { %v1142_v53 = vadd.f32 %v1141_v27, %v1140_v21 }
 0x2b6   : > { %v1144_v28 = vadd.f32 %v1143_v54, %v1142_v53 }
 0x2b8   : > { %v1409_v48 = vmul.f32 -1.442695, %v1144_v28 }
 0x2ba   : > { %1536 = vpow2.f32 %v1409_v48 }
 0x2c4   : > { %v1537_v9 = vpop.eup %1536 }
 0x2c5   : > { %v1148_v26 = vadd.f32 1.0, %v1537_v9 }
 0x2c7   : > { %1538 = vrcp.f32 %v1148_v26 }
 0x2d1   : > { %v1539_v17 = vpop.eup %1538 }
 0x2d2   : > { %v1151_v34 = vmul.f32 %v1539_v17, %v1144_v28 }
 0x2d4   : > { %v1157_v0 = vrot.slane %v1151_v34, %v1814_v59 }
 0x2d6   : > { %v1159_v16 = vmul.f32 %v1157_v0, %v1153_v39  ;;  %v1158_v14 = vmul.f32 %v1157_v0, %v1152_v36 }
 0x2d8   : > { %v1163_v31 = vsel %vm541_vm1, %v1159_v16, 0.0  ;;  %v1160_v19 = vsel %vm541_vm1, %v1158_v14, 0.0 }
 0x2d9   : > { %1164 = vadd.xlane.f32.xlu1 %v1163_v31  ;;  %1161 = vadd.xlane.f32.xlu0 %v1160_v19 }
 0x366   : > { %v1165_v1 = vpop.xlane.xlu1 %1164  ;;  %v1162_v37 = vpop.xlane.xlu0 %1161 }
 0x367   : > { %v1169_v6 = vadd.f32 %v1167_v41, %v1165_v1  ;;  %v1168_v59 = vadd.f32 %v1166_v42, %v1162_v37 }
 0x369   : > { %v1411_v40 = vmul.f32 -1.442695, %v1169_v6  ;;  %v1410_v22 = vmul.f32 -1.442695, %v1168_v59 }
 0x36b   : > { %1540 = vpow2.f32 %v1411_v40 }
 0x36c   : > { %1542 = vpow2.f32 %v1410_v22 }
 0x375   : > { %v1541_v12 = vpop.eup %1540 }
 0x376   : > { %v1543_v18 = vpop.eup %1542  ;;  %v1177_v44 = vadd.f32 1.0, %v1541_v12 }
 0x377   : > { %v1176_v62 = vadd.f32 1.0, %v1543_v18 }
 0x378   : > { %1544 = vrcp.f32 %v1177_v44 }
 0x379   : > { %1546 = vrcp.f32 %v1176_v62 }
 0x382   : > { %v1545_v3 = vpop.eup %1544 }
 0x383   : > { %v1547_v8 = vpop.eup %1546  ;;  %1189 = vperm.xlu1 %1502, %v1545_v3  }
 0x384   : > { %1184 = vperm.xlu0 %1501, %v1547_v8  }
 0x387   : > { %1276 = vperm.xlu1 %1502, %v1273_v49  }
 0x388   : > { %1284 = vperm.xlu0 %1501, %v1281_v32  }
 0x402   : > { %v1190_v38 = vpop.permute.xlu1 %1189 }
 0x403   : > { %v1194_v46 = vmul.f32 %v1190_v38, %v2109_v30  ;;  %v1195_v45 = vmul.f32 %v1190_v38, %v2111_v55  ;;  %v1185_v56 = vpop.permute.xlu0 %1184  ;;  %v1289_v30 = vunpack.c.l.bf16 %v1788_v11 }
 0x404   : > { %v1192_v47 = vmul.f32 %v1185_v56, %v2103_v51  ;;  %v1193_v43 = vmul.f32 %v1185_v56, %v2105_v7 }
 0x405   : > { %v1291_v61 = vcombine.high %v1289_v30, %v1289_v30 }
 0x406   : > { %v1421_v60 = vpack.c.bf16 %v1195_v45, %v1193_v43  ;;  %v1423_v35 = vpack.c.bf16 %v1194_v46, %v1192_v47  ;;  %v1277_v55 = vpop.permute.xlu1 %1276 }
 0x407   : > { %v1285_v63 = vpop.permute.xlu0 %1284 }
 0x408   : > { %1422 = vmatprep.subr.bf16.mxu1 %v1421_v60 }
 0x409   : > { %1424 = vmatpush1.bf16.msra.mxu1 %v1423_v35 }
 0x40c   : > { %1412 = vmatmul.mubr.msk.f32.vlgmr.msra.gmra.mrb[0].mxu1 %vm1198_vm10, %v1197_v52 }
 0x4df   : > { %v1268_v51 = vpop.f32.mrb[0].mxu1 }
 0x4e0   : > { %v1279_v57 = vmul.f32 %v1277_v55, %v1268_v51  ;;  %v1270_v7 = vpop.f32.mrb[1].mxu1 }
 0x4e1   : > { %v1280_v2 = vmul.f32 %v1277_v55, %v1270_v7 }
 0x4e2   : > { %v1287_v15 = vadd.f32 %v1285_v63, %v1279_v57 }
 0x4e3   : > { %v1288_v5 = vadd.f32 %v1285_v63, %v1280_v2 }
 0x4e4   : > { %v1293_v13 = vadd.f32 %v1289_v30, %v1287_v15 }
 0x4e5   : > { %v1294_v25 = vadd.f32 %v1291_v61, %v1288_v5 }
 0x4e7   : > { %v1413_v4 = vpack.c.bf16 %v1294_v25, %v1293_v13 }
 0x4e9   : > { %1414 = vst.sshfl [vmem:[%s515_s26] sm:$0x33 pattern:$0x76325410] %v1413_v4 }
 0x4ea   : > { %1561 = shalt.err (!%p1558_p3)
}
 0x4eb   : > { %s1562_s17 = scalar_lea.hbm %s2160_s27, 64  ;;  %s1566_s26 = scalar_lea.hbm %s2218_s16, 128 }
 0x4ec   : > { %p1563_p4 = scmp.ne.s32.totalorder %s2160_s27, %s1562_s17  ;;  %p1567_p9 = scmp.lt.u32.totalorder %s2160_s27, %s2218_s16 }
 0x4ed   : > { %p1568_p10 = scmp.lt.u32.totalorder %s1566_s26, %s1562_s17  ;;  %p1570_p12 = scmp.lt.u32.totalorder %s1562_s17, %s2160_s27 }
 0x4ee   : > { %p1564_p7 = pnand %p1563_p4, %p1755_p5 }
 0x4ef   : > { %p1569_p11 = por %p1568_p10, %p1567_p9 }
 0x4f0   : > { %p1565_p8 = pneg %p1564_p7 }
 0x4f1   : > { %p1571_p13 = por %p1570_p12, %p1569_p11 }
 0x4f3   : > { %p1572_p0 = pnand %p1571_p13, %p1565_p8 }
 0x4f5   : > { %1575 = shalt.err (!%p1572_p0)
}
 0x4f6   : > { %1425 = dma.vmem_to_hbm [thread:$0]  (%p1755_p5), %s2162_s21, 64, %s2160_s27, %s1310_s24  }
 0x4f7 PF: > { %p1431_p1 = scmp.ge.s32.totalorder %s1610_s22, 2  ;;  %s1336_s23 = sand.u32 1, %s1598_s20  }
 0x4f8   : > { %s1337_s3 = scalar_lea.sflag [#allocation3], %s1336_s23 }
 0x4f9   : > { %p1428_p2 = pnand %p1431_p1, %p1759_p6 }
 0x4fb   : > { %1593 = dma.done.wait (!%p1428_p2), %s1337_s3, 64  }
 0x4fc   : > { %1595 = vsyncadd (!%p1428_p2), %s1337_s3, 4294967232  ;;  %s2234_s22 = sld [smem:[#allocation6_spill]]  ;;  %s2235_s0 = sld [smem:[#allocation5_spill]] }
 0x4fd   : > { %s2236_s21 = sld [smem:[#allocation7_spill]]  ;;  %s2237_s20 = smov %s1602_s2 }
 0x502   : > { %p26_p3 = scmp.ge.s32.totalorder %s2234_s22, 4   ;;  %s2238_s2 = smov %s2235_s0 }
 0x504   :  { %28 = sbr.rel (!%p26_p3) target bundleno = 6 (0x6), region = 127 }
 0x50b   :  { %1342 = vsyncpa [#allocation3], 1 }
 0x50c   :  { %1344 = vsyncpa [#allocation3 + $0x1], 1 }

</bundles_post_ra>
